<compile_context>
chip_gen: v7x
topology: tpu7x:2x2x1
jax: 0.10.0
libtpu: 0.0.40
codegen_flags: <defaults>
</compile_context>

<pallas_src>
import functools
import math

import jax
import jax.numpy as jnp
from jax.experimental import pallas as pl
from jax.experimental.pallas import tpu as pltpu

MAX_ACTION = 1.0          # stands in for C.max_action (global config constant)
HIDDEN = 256
TILE_B_MAX = 2048         # rows per grid step; ~4-5 MiB footprint, safe everywhere


def _round_up(a, m):
    return ((a + m - 1) // m) * m


def actor_kernel(x_ref, w1_ref, b1_ref, w2_ref, b2_ref, wh_ref, bh_ref,
                 out_ref, *, outp):
    """One batch tile: two hidden layers + fused lane-dense (mean|std) head."""
    x = x_ref[...].astype(jnp.bfloat16)                       # (TILE_B, inp)

    # Layer 1: Linear + ReLU. Keep only the bf16 copy of h1 live.
    h1 = jnp.dot(x, w1_ref[...],
                 preferred_element_type=jnp.float32) + b1_ref[...]
    h1 = jnp.maximum(h1, 0.0).astype(jnp.bfloat16)

    # Layer 2: Linear + ReLU. Keep only the bf16 copy of h2 live.
    h2 = jnp.dot(h1, w2_ref[...],
                 preferred_element_type=jnp.float32) + b2_ref[...]
    h2 = jnp.maximum(h2, 0.0).astype(jnp.bfloat16)

    # Fused heads: one matmul -> lane-dense (TILE_B, 128) f32 result.
    # Columns [0:outp) carry the mean head, [outp:2*outp) the std head.
    z = jnp.dot(h2, wh_ref[...],
                preferred_element_type=jnp.float32) + bh_ref[...]

    mean_part = MAX_ACTION * jnp.tanh(z)                      # EUP tanh, f32
    std_part = jnp.exp(jnp.clip(z, -20.0, 2.0))               # EUP exp, f32

    # (1, head_pad) iota broadcast by where -> minimal vreg pressure.
    col = jax.lax.broadcasted_iota(jnp.int32, (1, z.shape[1]), 1)
    out_ref[...] = jnp.where(col < outp, mean_part, std_part)


def prepare_actor_params(raw, outp):
    """One-time prep: fuse + pad the two head layers into a single lane-dense
    (HIDDEN, head_pad) weight / (1, head_pad) bias. Cache the result with the
    parameters — never rebuild it per forward call."""
    head_pad = max(128, _round_up(2 * outp, 128))
    wh = jnp.zeros((HIDDEN, head_pad), jnp.bfloat16)
    wh = wh.at[:, :outp].set(raw["wm"]).at[:, outp:2 * outp].set(raw["ws"])
    bh = jnp.zeros((1, head_pad), jnp.float32)
    bh = bh.at[:, :outp].set(raw["bm"]).at[:, outp:2 * outp].set(raw["bs"])
    return {
        "w1": raw["w1"], "b1": raw["b1"],
        "w2": raw["w2"], "b2": raw["b2"],
        "wh": wh, "bh": bh,
    }


@functools.partial(jax.jit, static_argnames=("outp",))
def actor_forward(x, kparams, *, outp):
    """x: (batch, inp) float32. Returns (mean, std), each (batch, outp) f32."""
    batch, inp = x.shape
    head_pad = kparams["wh"].shape[1]

    # Aim for >= 2 grid steps so the "parallel" batch axis shards across both
    # TensorCores on v7x; on single-TC v5e/v6e the extra step costs ~0.35 us.
    tile_b = max(8, min(TILE_B_MAX, _round_up(pl.cdiv(batch, 2), 8)))
    grid = (pl.cdiv(batch, tile_b),)     # ragged last block handled by Pallas

    in_specs = [
        pl.BlockSpec((tile_b, inp), lambda i: (i, 0)),       # x: tiled on batch
        pl.BlockSpec((inp, HIDDEN), lambda i: (0, 0)),       # w1 (VMEM resident)
        pl.BlockSpec((1, HIDDEN), lambda i: (0, 0)),         # b1
        pl.BlockSpec((HIDDEN, HIDDEN), lambda i: (0, 0)),    # w2
        pl.BlockSpec((1, HIDDEN), lambda i: (0, 0)),         # b2
        pl.BlockSpec((HIDDEN, head_pad), lambda i: (0, 0)),  # fused head weight
        pl.BlockSpec((1, head_pad), lambda i: (0, 0)),       # fused head bias
    ]
    out_spec = pl.BlockSpec((tile_b, head_pad), lambda i: (i, 0))

    slab = pl.pallas_call(
        functools.partial(actor_kernel, outp=outp),
        grid=grid,
        in_specs=in_specs,
        out_specs=out_spec,
        out_shape=jax.ShapeDtypeStruct((batch, head_pad), jnp.float32),
        compiler_params=pltpu.CompilerParams(
            dimension_semantics=("parallel",)),
    )(x, kparams["w1"], kparams["b1"], kparams["w2"], kparams["b2"],
      kparams["wh"], kparams["bh"])

    # Only the first 2*outp lanes are meaningful; padded columns are dropped.
    mean = slab[:, :outp]
    std = slab[:, outp:2 * outp]
    return mean, std


def init_params(key, inp, outp):
    """Matches the PyTorch module init: weights ~ N(0, 0.1) stored transposed
    (in, out) in bf16, biases uniform(-1/sqrt(fan_in)) in f32 (1, out)."""
    ks = jax.random.split(key, 8)

    def w(k, fi, fo):
        return (0.1 * jax.random.normal(k, (fi, fo))).astype(jnp.bfloat16)

    def b(k, fi, fo):
        bound = 1.0 / math.sqrt(fi)
        return jax.random.uniform(k, (1, fo), minval=-bound,
                                  maxval=bound).astype(jnp.float32)

    return {
        "w1": w(ks[0], inp, HIDDEN),    "b1": b(ks[1], inp, HIDDEN),
        "w2": w(ks[2], HIDDEN, HIDDEN), "b2": b(ks[3], HIDDEN, HIDDEN),
        "wm": w(ks[4], HIDDEN, outp),   "bm": b(ks[5], HIDDEN, outp),
        "ws": w(ks[6], HIDDEN, outp),   "bs": b(ks[7], HIDDEN, outp),
    }


def reference_forward(x, raw):
    """Pure-JAX reference using the same bf16-weight / f32-accumulate path."""
    def mm(a, w):
        return jnp.dot(a.astype(jnp.bfloat16), w,
                       preferred_element_type=jnp.float32)

    h1 = jax.nn.relu(mm(x, raw["w1"]) + raw["b1"])
    h2 = jax.nn.relu(mm(h1, raw["w2"]) + raw["b2"])
    mean = MAX_ACTION * jnp.tanh(mm(h2, raw["wm"]) + raw["bm"])
    std = jnp.exp(jnp.clip(mm(h2, raw["ws"]) + raw["bs"], -20.0, 2.0))
    return mean, std


if __name__ == "__main__":
    key = jax.random.PRNGKey(0)
    k_param, k_x = jax.random.split(key)

    batch, state_dim, action_dim = 8, 16, 4
    raw_params = init_params(k_param, state_dim, action_dim)
    kparams = prepare_actor_params(raw_params, action_dim)   # one-time prep
    x = jax.random.normal(k_x, (batch, state_dim), dtype=jnp.float32)

    mean, std = actor_forward(x, kparams, outp=action_dim)
    jax.block_until_ready((mean, std))

    mean_ref, std_ref = reference_forward(x, raw_params)
    assert mean.shape == (batch, action_dim) and std.shape == (batch, action_dim)
    assert jnp.allclose(mean, mean_ref, atol=1e-3, rtol=1e-3)
    assert jnp.allclose(std, std_ref, atol=1e-3, rtol=1e-3)
    assert bool(jnp.all(std > 0.0))

    print("KERNEL_OK")
</pallas_src>

<mosaic_0001>
module attributes {stable_mosaic.version = 11 : i64} {
  func.func @actor_kernel(%arg0: i32, %arg1: memref<8x16xf32, #tpu.memory_space<vmem>>, %arg2: memref<16x256xbf16, #tpu.memory_space<vmem>>, %arg3: memref<1x256xf32, #tpu.memory_space<vmem>>, %arg4: memref<256x256xbf16, #tpu.memory_space<vmem>>, %arg5: memref<1x256xf32, #tpu.memory_space<vmem>>, %arg6: memref<256x128xbf16, #tpu.memory_space<vmem>>, %arg7: memref<1x128xf32, #tpu.memory_space<vmem>>, %arg8: memref<8x128xf32, #tpu.memory_space<vmem>>) attributes {dimension_semantics = [#tpu.dimension_semantics<parallel>], iteration_bounds = array<i64: 1>, scalar_prefetch = 0 : i64, scratch_operands = 0 : i64, tpu.core_type = #tpu.core_type<tc>, window_params = [{transform_indices = @transform_0, window_bounds = array<i64: 8, 16>}, {pipeline_mode = #tpu.pipeline_mode<synchronous>, transform_indices = @transform_1, window_bounds = array<i64: 16, 256>}, {pipeline_mode = #tpu.pipeline_mode<synchronous>, transform_indices = @transform_2, window_bounds = array<i64: 1, 256>}, {pipeline_mode = #tpu.pipeline_mode<synchronous>, transform_indices = @transform_3, window_bounds = array<i64: 256, 256>}, {pipeline_mode = #tpu.pipeline_mode<synchronous>, transform_indices = @transform_4, window_bounds = array<i64: 1, 256>}, {pipeline_mode = #tpu.pipeline_mode<synchronous>, transform_indices = @transform_5, window_bounds = array<i64: 256, 128>}, {pipeline_mode = #tpu.pipeline_mode<synchronous>, transform_indices = @transform_6, window_bounds = array<i64: 1, 128>}, {transform_indices = @transform_7, window_bounds = array<i64: 8, 128>}]} {
    %c0 = arith.constant 0 : index
    %c0_0 = arith.constant 0 : index
    %0 = vector.load %arg1[%c0, %c0_0] : memref<8x16xf32, #tpu.memory_space<vmem>>, vector<8x16xf32>
    %1 = arith.truncf %0 : vector<8x16xf32> to vector<8x16xbf16>
    %c0_1 = arith.constant 0 : index
    %c0_2 = arith.constant 0 : index
    %2 = vector.load %arg2[%c0_1, %c0_2] : memref<16x256xbf16, #tpu.memory_space<vmem>>, vector<16x256xbf16>
    %cst = arith.constant dense<0.000000e+00> : vector<8x256xf32>
    %3 = tpu.matmul %1, %2, %cst {dimension_numbers = #tpu.dot_dimension_numbers<[1], [0], [0], [1], [0, 0, 1, 1], [], []>} : vector<8x16xbf16>, vector<16x256xbf16>, vector<8x256xf32> -> vector<8x256xf32>
    %c0_3 = arith.constant 0 : index
    %c0_4 = arith.constant 0 : index
    %4 = vector.load %arg3[%c0_3, %c0_4] : memref<1x256xf32, #tpu.memory_space<vmem>>, vector<1x256xf32>
    %5 = vector.broadcast %4 : vector<1x256xf32> to vector<8x256xf32>
    %6 = arith.addf %3, %5 : vector<8x256xf32>
    %cst_5 = arith.constant 0.000000e+00 : f32
    %7 = vector.broadcast %cst_5 : f32 to vector<8x256xf32>
    %8 = arith.maximumf %6, %7 : vector<8x256xf32>
    %9 = arith.truncf %8 : vector<8x256xf32> to vector<8x256xbf16>
    %c0_6 = arith.constant 0 : index
    %c0_7 = arith.constant 0 : index
    %10 = vector.load %arg4[%c0_6, %c0_7] : memref<256x256xbf16, #tpu.memory_space<vmem>>, vector<256x256xbf16>
    %cst_8 = arith.constant dense<0.000000e+00> : vector<8x256xf32>
    %11 = tpu.matmul %9, %10, %cst_8 {dimension_numbers = #tpu.dot_dimension_numbers<[1], [0], [0], [1], [0, 0, 1, 1], [], []>} : vector<8x256xbf16>, vector<256x256xbf16>, vector<8x256xf32> -> vector<8x256xf32>
    %c0_9 = arith.constant 0 : index
    %c0_10 = arith.constant 0 : index
    %12 = vector.load %arg5[%c0_9, %c0_10] : memref<1x256xf32, #tpu.memory_space<vmem>>, vector<1x256xf32>
    %13 = vector.broadcast %12 : vector<1x256xf32> to vector<8x256xf32>
    %14 = arith.addf %11, %13 : vector<8x256xf32>
    %cst_11 = arith.constant 0.000000e+00 : f32
    %15 = vector.broadcast %cst_11 : f32 to vector<8x256xf32>
    %16 = arith.maximumf %14, %15 : vector<8x256xf32>
    %17 = arith.truncf %16 : vector<8x256xf32> to vector<8x256xbf16>
    %c0_12 = arith.constant 0 : index
    %c0_13 = arith.constant 0 : index
    %18 = vector.load %arg6[%c0_12, %c0_13] : memref<256x128xbf16, #tpu.memory_space<vmem>>, vector<256x128xbf16>
    %cst_14 = arith.constant dense<0.000000e+00> : vector<8x128xf32>
    %19 = tpu.matmul %17, %18, %cst_14 {dimension_numbers = #tpu.dot_dimension_numbers<[1], [0], [0], [1], [0, 0, 1, 1], [], []>} : vector<8x256xbf16>, vector<256x128xbf16>, vector<8x128xf32> -> vector<8x128xf32>
    %c0_15 = arith.constant 0 : index
    %c0_16 = arith.constant 0 : index
    %20 = vector.load %arg7[%c0_15, %c0_16] : memref<1x128xf32, #tpu.memory_space<vmem>>, vector<1x128xf32>
    %21 = vector.broadcast %20 : vector<1x128xf32> to vector<8x128xf32>
    %22 = arith.addf %19, %21 : vector<8x128xf32>
    %23 = math.tanh %22 : vector<8x128xf32>
    %cst_17 = arith.constant 1.000000e+00 : f32
    %24 = vector.broadcast %cst_17 : f32 to vector<8x128xf32>
    %25 = arith.mulf %24, %23 : vector<8x128xf32>
    %cst_18 = arith.constant -2.000000e+01 : f32
    %cst_19 = arith.constant 2.000000e+00 : f32
    %26 = vector.broadcast %cst_18 : f32 to vector<8x128xf32>
    %27 = arith.maximumf %26, %22 : vector<8x128xf32>
    %28 = vector.broadcast %cst_19 : f32 to vector<8x128xf32>
    %29 = arith.minimumf %28, %27 : vector<8x128xf32>
    %30 = math.exp %29 : vector<8x128xf32>
    %31 = tpu.iota {dimensions = array<i32: 1>} : vector<1x128xi32>
    %c4_i32 = arith.constant 4 : i32
    %32 = vector.broadcast %c4_i32 : i32 to vector<1x128xi32>
    %33 = arith.cmpi slt, %31, %32 : vector<1x128xi32>
    %34 = vector.shape_cast %33 : vector<1x128xi1> to vector<1x128xi1>
    %35 = vector.broadcast %34 : vector<1x128xi1> to vector<8x128xi1>
    %36 = arith.select %35, %25, %30 : vector<8x128xi1>, vector<8x128xf32>
    %c0_20 = arith.constant 0 : index
    %c0_21 = arith.constant 0 : index
    %37 = vector.load %arg8[%c0_20, %c0_21] : memref<8x128xf32, #tpu.memory_space<vmem>>, vector<8x128xf32>
    tpu.vector_store %arg8[%c0_20, %c0_21], %36 {strides = array<i32>} : memref<8x128xf32, #tpu.memory_space<vmem>>, vector<8x128xf32>,
    return
  }
  func.func @transform_0(%arg0: i32) -> (i32, i32) {
    %c0_i32 = arith.constant 0 : i32
    %c0_i32_0 = arith.constant 0 : i32
    return %arg0, %c0_i32 : i32, i32
  }
  func.func @transform_1(%arg0: i32) -> (i32, i32) {
    %c0_i32 = arith.constant 0 : i32
    %c0_i32_0 = arith.constant 0 : i32
    %c0_i32_1 = arith.constant 0 : i32
    return %c0_i32, %c0_i32_0 : i32, i32
  }
  func.func @transform_2(%arg0: i32) -> (i32, i32) {
    %c0_i32 = arith.constant 0 : i32
    %c0_i32_0 = arith.constant 0 : i32
    %c0_i32_1 = arith.constant 0 : i32
    return %c0_i32, %c0_i32_0 : i32, i32
  }
  func.func @transform_3(%arg0: i32) -> (i32, i32) {
    %c0_i32 = arith.constant 0 : i32
    %c0_i32_0 = arith.constant 0 : i32
    %c0_i32_1 = arith.constant 0 : i32
    return %c0_i32, %c0_i32_0 : i32, i32
  }
  func.func @transform_4(%arg0: i32) -> (i32, i32) {
    %c0_i32 = arith.constant 0 : i32
    %c0_i32_0 = arith.constant 0 : i32
    %c0_i32_1 = arith.constant 0 : i32
    return %c0_i32, %c0_i32_0 : i32, i32
  }
  func.func @transform_5(%arg0: i32) -> (i32, i32) {
    %c0_i32 = arith.constant 0 : i32
    %c0_i32_0 = arith.constant 0 : i32
    %c0_i32_1 = arith.constant 0 : i32
    return %c0_i32, %c0_i32_0 : i32, i32
  }
  func.func @transform_6(%arg0: i32) -> (i32, i32) {
    %c0_i32 = arith.constant 0 : i32
    %c0_i32_0 = arith.constant 0 : i32
    %c0_i32_1 = arith.constant 0 : i32
    return %c0_i32, %c0_i32_0 : i32, i32
  }
  func.func @transform_7(%arg0: i32) -> (i32, i32) {
    %c0_i32 = arith.constant 0 : i32
    %c0_i32_0 = arith.constant 0 : i32
    return %arg0, %c0_i32 : i32, i32
  }
}

</mosaic_0001>

<bundles_post_ra>
// kernel: actor_forward.1
= control target key start
LH: loop header
LB: loop body
LE: loop exit
PB: predicated region body
PF: predicated region fallthrough
CT: control target
= control target key end

     0   :  { %12 = vsyncpa [#allocation3], 0  ;;  %s961_s0 = inlined_call_operand.hbm [shape: f32[8,16], index: 0, kind: input, shape index: {}]   ;;  %s962_s1 = inlined_call_operand.hbm [shape: bf16[16,256], index: 1, kind: input, shape index: {}]   ;;  %s963_s2 = inlined_call_operand.vmem [shape: f32[1,256], index: 2, kind: input, shape index: {}]   ;;  %s964_s3 = inlined_call_operand.hbm [shape: bf16[256,256], index: 3, kind: input, shape index: {}]   ;;  %s965_s4 = inlined_call_operand.vmem [shape: f32[1,256], index: 4, kind: input, shape index: {}]   ;;  %s966_s5 = inlined_call_operand.hbm [shape: bf16[256,128], index: 5, kind: input, shape index: {}]   ;;  %s967_s6 = inlined_call_operand.vmem [shape: f32[1,128], index: 6, kind: input, shape index: {}]   ;;  %s968_s7 = inlined_call_operand.vmem [shape: f32[8,128], index: 7, kind: output, shape index: {}]  }
   0x1   :  { %13 = vsyncpa [#allocation5], 0 }
   0x2   :  { %14 = vsyncpa [#allocation8], 0  ;;  %s846_s24 = smov [#allocation4]   ;;  %s752_s28 = scalar_lea.hbm %s962_s1, 256 }
   0x3   :  { %s30_s25 = sshll.u32 %s846_s24, 4  ;;  %p753_p0 = scmp.ne.s32.totalorder %s962_s1, %s752_s28  ;;  %s31_s25 = int_to_ptr.vmem [resolvable:$true] %s30_s25 }
   0x4   :  { %p756_p1 = scmp.lt.u32.totalorder %s752_s28, %s962_s1 }
   0x6   :  { %p758_p2 = pnand %p756_p1, %p753_p0 }
   0x8   :  { %761 = shalt.err (!%p758_p2)
}
   0x9   :  { %s762_s10 = scalar_lea.vmem %s31_s25, 256  ;;  %p767_p4 = scmp.lt.s32.totalorder %s31_s25, %s31_s25 }
   0xa   :  { %p763_p3 = scmp.ne.s32.totalorder %s31_s25, %s762_s10  ;;  %p768_p5 = scmp.lt.s32.totalorder %s762_s10, %s762_s10 }
   0xc   :  { %p769_p6 = por %p768_p5, %p767_p4 }
   0xe   :  { %p770_p7 = pnand %p769_p6, %p763_p3 }
  0x10   :  { %773 = shalt.err (!%p770_p7)
}
  0x11   :  { %s847_s11 = smov 128   ;;  %s848_s12 = smov 8  }
  0x12   :  { %36 = dma.hbm_to_vmem [thread:$0]  %s962_s1, 256, %s31_s25, [#allocation5], %s847_s11, %s847_s11, %s848_s12  }
  0x13   :  { %s849_s15 = smov [#allocation2]   ;;  %s850_s17 = smov [#allocation6]  }
  0x14   :  { %s21_s16 = sshll.u32 %s849_s15, 4  ;;  %s44_s18 = sshll.u32 %s850_s17, 4  ;;  %s22_s16 = int_to_ptr.vmem [resolvable:$true] %s21_s16  ;;  %s45_s18 = int_to_ptr.vmem [resolvable:$true] %s44_s18 }
  0x15   :  { %s774_s21 = scalar_lea.hbm %s961_s0, 128 }
  0x16   :  { %p775_p8 = scmp.ne.s32.totalorder %s961_s0, %s774_s21  ;;  %p778_p9 = scmp.lt.u32.totalorder %s774_s21, %s961_s0 }
  0x18   :  { %p780_p10 = pnand %p778_p9, %p775_p8 }
  0x1a   :  { %783 = shalt.err (!%p780_p10)
}
  0x1b   :  { %s784_s1 = scalar_lea.vmem %s22_s16, 128  ;;  %p789_p12 = scmp.lt.s32.totalorder %s22_s16, %s22_s16 }
  0x1c   :  { %p785_p11 = scmp.ne.s32.totalorder %s22_s16, %s784_s1  ;;  %p790_p13 = scmp.lt.s32.totalorder %s784_s1, %s784_s1 }
  0x1e   :  { %p791_p0 = por %p790_p13, %p789_p12 }
  0x20   :  { %p792_p1 = pnand %p791_p0, %p785_p11 }
  0x22   :  { %795 = shalt.err (!%p792_p1)
}
  0x23   :  { %24 = dma.hbm_to_vmem [thread:$0]  %s961_s0, 128, %s22_s16, [#allocation3]  }
  0x24   :  { %s796_s30 = scalar_lea.hbm %s964_s3, 4096 }
  0x25   :  { %p797_p2 = scmp.ne.s32.totalorder %s964_s3, %s796_s30  ;;  %p800_p3 = scmp.lt.u32.totalorder %s796_s30, %s964_s3 }
  0x27   :  { %p802_p4 = pnand %p800_p3, %p797_p2 }
  0x29   :  { %805 = shalt.err (!%p802_p4)
}
  0x2a   :  { %s806_s14 = scalar_lea.vmem %s45_s18, 4096  ;;  %p811_p6 = scmp.lt.s32.totalorder %s45_s18, %s45_s18 }
  0x2b   :  { %p807_p5 = scmp.ne.s32.totalorder %s45_s18, %s806_s14  ;;  %p812_p7 = scmp.lt.s32.totalorder %s806_s14, %s806_s14 }
  0x2d   :  { %p813_p8 = por %p812_p7, %p811_p6 }
  0x2f   :  { %p814_p9 = pnand %p813_p8, %p807_p5 }
  0x31   :  { %817 = shalt.err (!%p814_p9)
}
  0x32   :  { %50 = dma.hbm_to_vmem [thread:$0]  %s964_s3, 4096, %s45_s18, [#allocation5], %s847_s11, %s847_s11, %s848_s12  }
  0x33   :  { %s851_s16 = smov [#allocation7]   ;;  %s818_s21 = scalar_lea.hbm %s966_s5, 2048 }
  0x34   :  { %s58_s17 = sshll.u32 %s851_s16, 4  ;;  %p819_p10 = scmp.ne.s32.totalorder %s966_s5, %s818_s21  ;;  %s59_s17 = int_to_ptr.vmem [resolvable:$true] %s58_s17 }
  0x35   :  { %p822_p11 = scmp.lt.u32.totalorder %s818_s21, %s966_s5 }
  0x37   :  { %p824_p12 = pnand %p822_p11, %p819_p10 }
  0x39   :  { %827 = shalt.err (!%p824_p12)
}
  0x3a   :  { %s828_s1 = scalar_lea.vmem %s59_s17, 2048  ;;  %p833_p0 = scmp.lt.s32.totalorder %s59_s17, %s59_s17 }
  0x3b   :  { %p829_p13 = scmp.ne.s32.totalorder %s59_s17, %s828_s1  ;;  %p834_p1 = scmp.lt.s32.totalorder %s828_s1, %s828_s1 }
  0x3d   :  { %p835_p2 = por %p834_p1, %p833_p0 }
  0x3f   :  { %p836_p3 = pnand %p835_p2, %p829_p13 }
  0x41   :  { %839 = shalt.err (!%p836_p3)
}
  0x42   :  { %s852_s3 = smov 64   ;;  %s853_s11 = smov 4  }
  0x43   :  { %64 = dma.hbm_to_vmem [thread:$0]  %s966_s5, 2048, %s59_s17, [#allocation8], %s852_s3, %s852_s3, %s853_s11  }
  0x44   :  { %840 = dma.done.wait [#allocation3], 128  }
  0x45   :  { %841 = vsyncadd [#allocation3], 4294967168 }
  0x46   :  { %842 = dma.done.wait [#allocation5], 4352  }
  0x47   :  { %843 = vsyncadd [#allocation5], 4294962944 }
  0x48   :  { %844 = dma.done.wait [#allocation8], 2048  }
  0x49   :  { %845 = vsyncadd [#allocation8], 4294965248  ;;  %v854_v0 = vmov 0   ;;  %v681_v1 = vld [vmem:[#allocation4 + $0x4] ss:$8 sps:$4 sm:$0xff]   ;;  %v80_v3 = vld [vmem:[#allocation2] sm:$0xff]  ;;  %v86_v49 = vlaneseq }
  0x4a   :  { %142 = vmatprep.mubr.bf16.mxu0 %v854_v0  ;;  %v683_v2 = vld [vmem:[#allocation4] ss:$8 sps:$4 sm:$0xff]   ;;  %110 = vmatprep.subr.bf16.mxu0 %v681_v1  ;;  %v81_v4 = vpack.c.bf16 %v80_v3, %v80_v3  ;;  %v684_v5 = vld [vmem:[#allocation6 + $0x4] ss:$8 sps:$4 sm:$0xff]   ;;  %v686_v6 = vld [vmem:[#allocation6] ss:$8 sps:$4 sm:$0xff]  }
  0x4b   :  { %111 = vmatpush1.bf16.msra.mxu0 %v683_v2  ;;  %vm106_vm0 = vcmask 130048   ;;  %v687_v7 = vld [vmem:[#allocation6 + $0x14] ss:$8 sps:$4 sm:$0xff]   ;;  %359 = vmatprep.subr.bf16.mxu1 %v684_v5  ;;  %v689_v8 = vld [vmem:[#allocation6 + $0x10] ss:$8 sps:$4 sm:$0xff]   ;;  %v732_v37 = vld [vmem:[#allocation7 + $0x40] sm:$0xff]  }
  0x4c   :  { %360 = vmatpush1.bf16.msra.mxu1 %v686_v6  ;;  %v690_v9 = vld [vmem:[#allocation6 + $0x24] ss:$8 sps:$4 sm:$0xff]   ;;  %v692_v10 = vld [vmem:[#allocation6 + $0x20] ss:$8 sps:$4 sm:$0xff]   ;;  %v693_v11 = vld [vmem:[#allocation6 + $0x34] ss:$8 sps:$4 sm:$0xff]   ;;  %650 = vmatprep.subr.bf16.mxu0 %v732_v37 }
  0x4d   :  { %361 = vmatprep.subr.bf16.mxu1 %v687_v7  ;;  %v695_v12 = vld [vmem:[#allocation6 + $0x30] ss:$8 sps:$4 sm:$0xff]   ;;  %v696_v13 = vld [vmem:[#allocation6 + $0x44] ss:$8 sps:$4 sm:$0xff]   ;;  %v698_v14 = vld [vmem:[#allocation6 + $0x40] ss:$8 sps:$4 sm:$0xff]  }
  0x4e   :  { %600 = vmatmul.mubr.msk.bf16.vlgmr.msra.gmra.mrb[0].mxu0 %vm106_vm0, %v81_v4  ;;  %v699_v15 = vld [vmem:[#allocation6 + $0x54] ss:$8 sps:$4 sm:$0xff]   ;;  %v701_v16 = vld [vmem:[#allocation6 + $0x50] ss:$8 sps:$4 sm:$0xff]   ;;  %v702_v17 = vld [vmem:[#allocation6 + $0x64] ss:$8 sps:$4 sm:$0xff]  }
  0x4f   :  { %v704_v18 = vld [vmem:[#allocation6 + $0x60] ss:$8 sps:$4 sm:$0xff]   ;;  %v705_v19 = vld [vmem:[#allocation6 + $0x74] ss:$8 sps:$4 sm:$0xff]   ;;  %v707_v20 = vld [vmem:[#allocation6 + $0x70] ss:$8 sps:$4 sm:$0xff]  }
  0x50   :  { %362 = vmatpush1.bf16.msra.mxu1 %v689_v8  ;;  %v708_v21 = vld [vmem:[#allocation6 + $0x84] ss:$8 sps:$4 sm:$0xff]   ;;  %v710_v22 = vld [vmem:[#allocation6 + $0x80] ss:$8 sps:$4 sm:$0xff]   ;;  %v711_v23 = vld [vmem:[#allocation6 + $0x94] ss:$8 sps:$4 sm:$0xff]  }
  0x51   :  { %363 = vmatprep.subr.bf16.mxu1 %v690_v9  ;;  %v713_v24 = vld [vmem:[#allocation6 + $0x90] ss:$8 sps:$4 sm:$0xff]   ;;  %v714_v25 = vld [vmem:[#allocation6 + $0xa4] ss:$8 sps:$4 sm:$0xff]   ;;  %v716_v26 = vld [vmem:[#allocation6 + $0xa0] ss:$8 sps:$4 sm:$0xff]  }
  0x52   :  { %v717_v27 = vld [vmem:[#allocation6 + $0xb4] ss:$8 sps:$4 sm:$0xff]   ;;  %v719_v28 = vld [vmem:[#allocation6 + $0xb0] ss:$8 sps:$4 sm:$0xff]   ;;  %v720_v29 = vld [vmem:[#allocation6 + $0xc4] ss:$8 sps:$4 sm:$0xff]  }
  0x53   :  { %v722_v30 = vld [vmem:[#allocation6 + $0xc0] ss:$8 sps:$4 sm:$0xff]   ;;  %v723_v31 = vld [vmem:[#allocation6 + $0xd4] ss:$8 sps:$4 sm:$0xff]   ;;  %v725_v32 = vld [vmem:[#allocation6 + $0xd0] ss:$8 sps:$4 sm:$0xff]  }
  0x54   :  { %364 = vmatpush1.bf16.msra.mxu1 %v692_v10  ;;  %v726_v33 = vld [vmem:[#allocation6 + $0xe4] ss:$8 sps:$4 sm:$0xff]   ;;  %v728_v34 = vld [vmem:[#allocation6 + $0xe0] ss:$8 sps:$4 sm:$0xff]   ;;  %v729_v35 = vld [vmem:[#allocation6 + $0xf4] ss:$8 sps:$4 sm:$0xff]  }
  0x55   :  { %365 = vmatprep.subr.bf16.mxu1 %v693_v11  ;;  %v731_v36 = vld [vmem:[#allocation6 + $0xf0] ss:$8 sps:$4 sm:$0xff]   ;;  %v733_v38 = vld [vmem:[#allocation7] sm:$0xff]   ;;  %v734_v39 = vld [vmem:[#allocation7 + $0x48] sm:$0xff]   ;;  %v87_v50 = vshrl.u32 %v86_v49, 7 }
  0x56   :  { %651 = vmatpush3.bf16.msra.mxu0 %v733_v38  ;;  %v735_v40 = vld [vmem:[#allocation7 + $0x8] sm:$0xff]   ;;  %v736_v41 = vld [vmem:[#allocation7 + $0x50] sm:$0xff]   ;;  %v738_v43 = vld [vmem:[#allocation7 + $0x58] sm:$0xff]  }
  0x57   :  { %652 = vmatprep.subr.bf16.mxu0 %v734_v39  ;;  %v737_v42 = vld [vmem:[#allocation7 + $0x10] sm:$0xff]   ;;  %v739_v44 = vld [vmem:[#allocation7 + $0x18] sm:$0xff]   ;;  %v740_v45 = vld [vmem:[#allocation7 + $0x60] sm:$0xff]   ;;  %v88_v51 = vsub.s32 0, %v87_v50  ;;  %v92_v53 = vsub.s32 1, %v87_v50 }
  0x58   :  { %366 = vmatpush1.bf16.msra.mxu1 %v695_v12  ;;  %v741_v46 = vld [vmem:[#allocation7 + $0x20] sm:$0xff]   ;;  %v742_v47 = vld [vmem:[#allocation7 + $0x68] sm:$0xff]   ;;  %v744_v2 = vld [vmem:[#allocation7 + $0x70] sm:$0xff]  }
  0x59   :  { %367 = vmatprep.subr.bf16.mxu1 %v696_v13  ;;  %v743_v48 = vld [vmem:[#allocation7 + $0x28] sm:$0xff]   ;;  %v745_v3 = vld [vmem:[#allocation7 + $0x30] sm:$0xff]   ;;  %v746_v4 = vld [vmem:[#allocation7 + $0x78] sm:$0xff]  }
  0x5a   :  { %653 = vmatpush3.bf16.msra.mxu0 %v735_v40  ;;  %v84_v52 = vld [vmem:[%s963_s2] sm:$0x3]  ;;  %v747_v5 = vld [vmem:[#allocation7 + $0x38] sm:$0xff]  }
  0x5b   :  { %654 = vmatprep.subr.bf16.mxu0 %v736_v41  ;;  %v89_v54 = vrot.slane %v84_v52, %v88_v51  ;;  %v93_v55 = vrot.slane %v84_v52, %v92_v53  ;;  %v187_v6 = vld [vmem:[%s965_s4] sm:$0x3] }
  0x5c   :  { %368 = vmatpush1.bf16.msra.mxu1 %v698_v14  ;;  %v192_v7 = vrot.slane %v187_v6, %v88_v51  ;;  %v196_v8 = vrot.slane %v187_v6, %v92_v53 }
  0x5d   :  { %369 = vmatprep.subr.bf16.mxu1 %v699_v15 }
  0x5e   :  { %655 = vmatpush3.bf16.msra.mxu0 %v737_v42 }
  0x5f   :  { %656 = vmatprep.subr.bf16.mxu0 %v738_v43 }
  0x60   :  { %370 = vmatpush1.bf16.msra.mxu1 %v701_v16 }
  0x61   :  { %371 = vmatprep.subr.bf16.mxu1 %v702_v17 }
  0x62   :  { %657 = vmatpush3.bf16.msra.mxu0 %v739_v44 }
  0x63   :  { %658 = vmatprep.subr.bf16.mxu0 %v740_v45 }
  0x64   :  { %372 = vmatpush1.bf16.msra.mxu1 %v704_v18 }
  0x65   :  { %373 = vmatprep.subr.bf16.mxu1 %v705_v19 }
  0x66   :  { %659 = vmatpush3.bf16.msra.mxu0 %v741_v46 }
  0x67   :  { %660 = vmatprep.subr.bf16.mxu0 %v742_v47 }
  0x68   :  { %374 = vmatpush1.bf16.msra.mxu1 %v707_v20  ;;  %v633_v20 = vld [vmem:[%s967_s6] ss:$0 sm:$0xff] }
  0x69   :  { %375 = vmatprep.subr.bf16.mxu1 %v708_v21 }
  0x6a   :  { %661 = vmatpush3.bf16.msra.mxu0 %v743_v48 }
  0x6b   :  { %662 = vmatprep.subr.bf16.mxu0 %v744_v2 }
  0x6c   :  { %376 = vmatpush1.bf16.msra.mxu1 %v710_v22 }
  0x6d   :  { %377 = vmatprep.subr.bf16.mxu1 %v711_v23 }
  0x6e   :  { %663 = vmatpush3.bf16.msra.mxu0 %v745_v3 }
  0x6f   :  { %664 = vmatprep.subr.bf16.mxu0 %v746_v4 }
  0x70   :  { %378 = vmatpush1.bf16.msra.mxu1 %v713_v24 }
  0x71   :  { %379 = vmatprep.subr.bf16.mxu1 %v714_v25 }
  0x72   :  { %665 = vmatpush3.bf16.msra.mxu0 %v747_v5 }
  0x74   :  { %380 = vmatpush1.bf16.msra.mxu1 %v716_v26 }
  0x75   :  { %381 = vmatprep.subr.bf16.mxu1 %v717_v27 }
  0x78   :  { %382 = vmatpush1.bf16.msra.mxu1 %v719_v28 }
  0x79   :  { %383 = vmatprep.subr.bf16.mxu1 %v720_v29  ;;  %v585_v29 = vand.u32 127, %v86_v49 }
  0x7b   :  { %vm586_vm1 = vcmp.lt.s32.totalorder %v585_v29, 4 }
  0x7c   :  { %384 = vmatpush1.bf16.msra.mxu1 %v722_v30 }
  0x7d   :  { %385 = vmatprep.subr.bf16.mxu1 %v723_v31 }
  0x80   :  { %386 = vmatpush1.bf16.msra.mxu1 %v725_v32 }
  0x81   :  { %387 = vmatprep.subr.bf16.mxu1 %v726_v33 }
  0x84   :  { %388 = vmatpush1.bf16.msra.mxu1 %v728_v34 }
  0x85   :  { %389 = vmatprep.subr.bf16.mxu1 %v729_v35 }
  0x88   :  { %390 = vmatpush1.bf16.msra.mxu1 %v731_v36 }
 0x121   :  { %v144_v56 = vpop.f32.mrb[0].mxu0 }
 0x122   :  { %v145_v57 = vadd.f32 %v144_v56, %v89_v54  ;;  %v146_v58 = vpop.f32.mrb[1].mxu0 }
 0x123   :  { %v147_v59 = vadd.f32 %v146_v58, %v93_v55  ;;  %v148_v60 = vpop.f32.mrb[2].mxu0 }
 0x124   :  { %v151_v61 = vmax.f32 %v145_v57, 0.0  ;;  %v149_v62 = vpop.f32.mrb[3].mxu0 }
 0x125   :  { %v152_v63 = vmax.f32 %v147_v59, 0.0 }
 0x126   :  { %v153_v1 = vpack.c.bf16 %v151_v61, %v151_v61 }
 0x127   :  { %v154_v0 = vpack.c.bf16 %v152_v63, %v152_v63 }
 0x129   :  { %391 = vmatprep.mubr.bf16.mxu1 %v154_v0 }
 0x12a   :  { %392 = vmatmul.mubr.bf16.vlgmr.msra.gmra.mrb[0].mxu1 %v153_v1 }
 0x1fd   :  { %v393_v9 = vpop.f32.mrb[0].mxu1 }
 0x1fe   :  { %v394_v10 = vadd.f32 %v393_v9, %v192_v7  ;;  %v395_v11 = vpop.f32.mrb[1].mxu1 }
 0x1ff   :  { %v396_v12 = vadd.f32 %v395_v11, %v196_v8  ;;  %v397_v13 = vpop.f32.mrb[2].mxu1 }
 0x200   :  { %v400_v14 = vmax.f32 %v394_v10, 0.0  ;;  %v398_v15 = vpop.f32.mrb[3].mxu1 }
 0x201   :  { %v401_v16 = vmax.f32 %v396_v12, 0.0 }
 0x202   :  { %v402_v18 = vpack.c.bf16 %v400_v14, %v400_v14 }
 0x203   :  { %v403_v17 = vpack.c.bf16 %v401_v16, %v401_v16 }
 0x205   :  { %571 = vmatprep.mubr.bf16.mxu0 %v403_v17 }
 0x206   :  { %572 = vmatmul.mubr.bf16.vlgmr.msra.gmra.mrb[4].mxu0 %v402_v18 }
 0x2d9   :  { %v666_v19 = vpop.f32.mrb[4].mxu0 }
 0x2da   :  { %v667_v21 = vpop.f32.mrb[5].mxu0 }
 0x2db   :  { %v668_v22 = vadd.f32 %v667_v21, %v666_v19  ;;  %v669_v23 = vpop.f32.mrb[6].mxu0 }
 0x2dc   :  { %v670_v24 = vpop.f32.mrb[7].mxu0 }
 0x2dd   :  { %v574_v25 = vadd.f32 %v668_v22, %v633_v20 }
 0x2df   :  { %v580_v26 = vmax.f32 %v574_v25, -20.0  ;;  %748 = vtanh.f32 %v574_v25 }
 0x2e1   :  { %v581_v27 = vmin.f32 %v580_v26, 2.0 }
 0x2e3   :  { %v582_v28 = vmul.f32 1.442695, %v581_v27 }
 0x2e5   :  { %750 = vpow2.f32 %v582_v28 }
 0x2e9   :  { %v749_v30 = vpop.eup %748 }
 0x2ef   :  { %v751_v31 = vpop.eup %750 }
 0x2f0   :  { %v589_v32 = vsel %vm586_vm1, %v749_v30, %v751_v31 }
 0x2f1   :  { %590 = vst [vmem:[%s968_s7] sm:$0xff] %v589_v32 }
 0x2f2   :  { %595 = vsyncpa [#allocation3], 1 }
 0x2f3   :  { %596 = vsyncpa [#allocation5], 1 }
 0x2f4   :  { %597 = vsyncpa [#allocation8], 1 }

</bundles_post_ra>
